<compile_context>
chip_gen: v7x
topology: tpu7x:2x2x1
jax: 0.10.0
libtpu: 0.0.40
codegen_flags: <defaults>
</compile_context>

<pallas_src>
import functools

import jax
import jax.numpy as jnp
from jax.experimental import pallas as pl
from jax.experimental.pallas import tpu as pltpu


def _mean_kernel(x_ref, o_ref, acc_ref, *, s_total, ts):
    si = pl.program_id(1)

    @pl.when(si == 0)
    def _():
        acc_ref[...] = jnp.zeros_like(acc_ref)

    x = x_ref[...]
    if s_total % ts != 0:
        # Last S tile is partial: zero the padded rows so out-of-bounds
        # garbage never reaches the accumulator.
        row = jax.lax.broadcasted_iota(jnp.int32, x.shape, dimension=1) + si * ts
        x = jnp.where(row < s_total, x, 0)

    # Partial sum over this S tile; the input-dtype -> f32 cast is fused into
    # the reduction (no extra live f32 copy of the tile).
    acc_ref[...] += jnp.sum(x, axis=1, dtype=jnp.float32)

    @pl.when(si == pl.num_programs(1) - 1)
    def _():
        # Single 1/S scale at finalize, using the FULL sequence length.
        o_ref[...] = (acc_ref[...] * (1.0 / s_total)).astype(o_ref.dtype)


def mean_extractor(x: jnp.ndarray, *, block_bytes: int = 2 * 1024 * 1024) -> jnp.ndarray:
    """Pallas equivalent of MeanExtractor.forward: mean over dim=1."""
    b, s, d = x.shape
    itemsize = jnp.dtype(x.dtype).itemsize

    # ---- tile sizes --------------------------------------------------------
    # Batch tile: full batch if small, else 8-row tiles (a tiled dim must be
    # a multiple of 8 sublanes or the full extent).
    tb = b if b <= 8 else 8
    # Sequence tile: as many rows as fit in ~block_bytes per input block,
    # rounded down to a multiple of 8 (or the full extent if it all fits).
    rows = max(1, block_bytes // max(1, tb * d * itemsize))
    ts = s if rows >= s else max(8, (rows // 8) * 8)
    n_b = pl.cdiv(b, tb)
    n_s = pl.cdiv(s, ts)

    kernel = functools.partial(_mean_kernel, s_total=s, ts=ts)

    return pl.pallas_call(
        kernel,
        out_shape=jax.ShapeDtypeStruct((b, d), x.dtype),
        grid=(n_b, n_s),
        in_specs=[pl.BlockSpec((tb, ts, d), lambda bi, si: (bi, si, 0))],
        # Same output block across every S step -> output-resident accumulator.
        out_specs=pl.BlockSpec((tb, d), lambda bi, si: (bi, 0)),
        scratch_shapes=[pltpu.VMEM((tb, d), jnp.float32)],
        compiler_params=pltpu.CompilerParams(
            dimension_semantics=("parallel", "arbitrary")),
        cost_estimate=pl.CostEstimate(
            flops=b * s * d,
            transcendentals=0,
            bytes_accessed=b * s * d * itemsize + b * d * itemsize),
    )(x)


if __name__ == "__main__":
    key = jax.random.PRNGKey(0)

    # Module hyperparams (unused in forward, kept for fidelity):
    n_latents, embed_dim, n_heads = 8, 32, 2

    # 1) Module-faithful toy shape: (batch, n_latents, embed_dim).
    batch = 2
    x = jax.random.normal(key, (batch, n_latents, embed_dim), dtype=jnp.float32)
    out = jax.block_until_ready(mean_extractor(x))
    ref = jnp.mean(x, axis=1)
    assert out.shape == (batch, embed_dim)
    assert jnp.allclose(out, ref, atol=1e-6, rtol=1e-6)

    # 2) Shape that exercises S tiling + the partial-last-tile mask path
    #    (tiny block budget forces ts=8 over S=100 -> 13 S steps, remainder 4).
    k2 = jax.random.fold_in(key, 1)
    x2 = jax.random.normal(k2, (4, 100, 256), dtype=jnp.float32)
    out2 = jax.block_until_ready(mean_extractor(x2, block_bytes=16 * 1024))
    ref2 = jnp.mean(x2, axis=1)
    assert jnp.allclose(out2, ref2, atol=1e-5, rtol=1e-5)

    # 3) bf16 input: f32 accumulation in-kernel, cast back at the final store.
    k3 = jax.random.fold_in(key, 2)
    x3 = jax.random.normal(k3, (2, 64, 128), dtype=jnp.bfloat16)
    out3 = jax.block_until_ready(mean_extractor(x3))
    ref3 = jnp.mean(x3.astype(jnp.float32), axis=1).astype(jnp.bfloat16)
    assert jnp.allclose(out3.astype(jnp.float32), ref3.astype(jnp.float32),
                        atol=1e-2, rtol=1e-2)

    print("KERNEL_OK")
</pallas_src>

<mosaic_0001>
module attributes {stable_mosaic.version = 11 : i64} {
  func.func @_mean_kernel(%arg0: i32, %arg1: i32, %arg2: memref<2x8x32xf32, #tpu.memory_space<vmem>>, %arg3: memref<2x32xf32, #tpu.memory_space<vmem>>, %arg4: memref<2x32xf32, #tpu.memory_space<vmem>>) attributes {dimension_semantics = [#tpu.dimension_semantics<parallel>, #tpu.dimension_semantics<arbitrary>], iteration_bounds = array<i64: 1, 1>, scalar_prefetch = 0 : i64, scratch_operands = 1 : i64, tpu.core_type = #tpu.core_type<tc>, window_params = [{transform_indices = @transform_0, window_bounds = array<i64: 2, 8, 32>}, {transform_indices = @transform_1, window_bounds = array<i64: 2, 32>}]} {
    %c0_i32 = arith.constant 0 : i32
    %0 = arith.cmpi eq, %arg1, %c0_i32 : i32
    %1 = arith.extui %0 : i1 to i32
    %c0_i32_0 = arith.constant 0 : i32
    %2 = arith.cmpi ne, %1, %c0_i32_0 : i32
    scf.if %2 {
      %cst_9 = arith.constant 0.000000e+00 : f32
      %11 = vector.broadcast %cst_9 : f32 to vector<2x32xf32>
      %c0_10 = arith.constant 0 : index
      %c0_11 = arith.constant 0 : index
      %12 = vector.load %arg4[%c0_10, %c0_11] : memref<2x32xf32, #tpu.memory_space<vmem>>, vector<2x32xf32>
      tpu.vector_store %arg4[%c0_10, %c0_11], %11 {strides = array<i32>} : memref<2x32xf32, #tpu.memory_space<vmem>>, vector<2x32xf32>,
    } else {
    }
    %c0 = arith.constant 0 : index
    %c0_1 = arith.constant 0 : index
    %c0_2 = arith.constant 0 : index
    %3 = vector.load %arg2[%c0, %c0_1, %c0_2] : memref<2x8x32xf32, #tpu.memory_space<vmem>>, vector<2x8x32xf32>
    %c0_3 = arith.constant 0 : index
    %c0_4 = arith.constant 0 : index
    %4 = vector.load %arg4[%c0_3, %c0_4] : memref<2x32xf32, #tpu.memory_space<vmem>>, vector<2x32xf32>
    %cst = arith.constant dense<0.000000e+00> : vector<2x32xf32>
    %5 = vector.multi_reduction <add>, %3, %cst [1] : vector<2x8x32xf32> to vector<2x32xf32>
    %6 = arith.addf %4, %5 : vector<2x32xf32>
    %c0_5 = arith.constant 0 : index
    %c0_6 = arith.constant 0 : index
    %7 = vector.load %arg4[%c0_5, %c0_6] : memref<2x32xf32, #tpu.memory_space<vmem>>, vector<2x32xf32>
    tpu.vector_store %arg4[%c0_5, %c0_6], %6 {strides = array<i32>} : memref<2x32xf32, #tpu.memory_space<vmem>>, vector<2x32xf32>,
    %c0_i32_7 = arith.constant 0 : i32
    %8 = arith.cmpi eq, %arg1, %c0_i32_7 : i32
    %9 = arith.extui %8 : i1 to i32
    %c0_i32_8 = arith.constant 0 : i32
    %10 = arith.cmpi ne, %9, %c0_i32_8 : i32
    scf.if %10 {
      %c0_9 = arith.constant 0 : index
      %c0_10 = arith.constant 0 : index
      %11 = vector.load %arg4[%c0_9, %c0_10] : memref<2x32xf32, #tpu.memory_space<vmem>>, vector<2x32xf32>
      %cst_11 = arith.constant 1.250000e-01 : f32
      %12 = vector.broadcast %cst_11 : f32 to vector<2x32xf32>
      %13 = arith.mulf %11, %12 : vector<2x32xf32>
      %c0_12 = arith.constant 0 : index
      %c0_13 = arith.constant 0 : index
      %14 = vector.load %arg3[%c0_12, %c0_13] : memref<2x32xf32, #tpu.memory_space<vmem>>, vector<2x32xf32>
      tpu.vector_store %arg3[%c0_12, %c0_13], %13 {strides = array<i32>} : memref<2x32xf32, #tpu.memory_space<vmem>>, vector<2x32xf32>,
    } else {
    }
    return
  }
  func.func @transform_0(%arg0: i32, %arg1: i32) -> (i32, i32, i32) {
    %c0_i32 = arith.constant 0 : i32
    %c0_i32_0 = arith.constant 0 : i32
    return %arg0, %arg1, %c0_i32 : i32, i32, i32
  }
  func.func @transform_1(%arg0: i32, %arg1: i32) -> (i32, i32) {
    %c0_i32 = arith.constant 0 : i32
    %c0_i32_0 = arith.constant 0 : i32
    return %arg0, %c0_i32 : i32, i32
  }
}

</mosaic_0001>

<bundles_post_ra>
// kernel: tpu_custom_call.1
= control target key start
LH: loop header
LB: loop body
LE: loop exit
PB: predicated region body
PF: predicated region fallthrough
CT: control target
= control target key end

     0   :  { %6 = vsyncpa [#allocation4], 0  ;;  %s171_s0 = inlined_call_operand.hbm [shape: f32[2,8,32], index: 0, kind: input, shape index: {}]   ;;  %s172_s1 = inlined_call_operand.hbm [shape: f32[2,32], index: 1, kind: output, shape index: {}]  }
   0x1   :  { %7 = vsyncpa [#allocation5], 0  ;;  %s129_s6 = smov [#allocation3]   ;;  %s81_s10 = scalar_lea.hbm %s171_s0, 256 }
   0x2   :  { %s13_s7 = sshll.u32 %s129_s6, 4  ;;  %p82_p0 = scmp.ne.s32.totalorder %s171_s0, %s81_s10  ;;  %s14_s7 = int_to_ptr.vmem [resolvable:$true] %s13_s7 }
   0x3   :  { %p85_p1 = scmp.lt.u32.totalorder %s81_s10, %s171_s0 }
   0x5   :  { %p87_p2 = pnand %p85_p1, %p82_p0 }
   0x7   :  { %90 = shalt.err (!%p87_p2)
}
   0x8   :  { %s91_s15 = scalar_lea.vmem %s14_s7, 256  ;;  %p96_p4 = scmp.lt.s32.totalorder %s14_s7, %s14_s7 }
   0x9   :  { %p92_p3 = scmp.ne.s32.totalorder %s14_s7, %s91_s15  ;;  %p97_p5 = scmp.lt.s32.totalorder %s91_s15, %s91_s15 }
   0xb   :  { %p98_p6 = por %p97_p5, %p96_p4 }
   0xd   :  { %p99_p7 = pnand %p98_p6, %p92_p3 }
   0xf   :  { %102 = shalt.err (!%p99_p7)
}
  0x10   :  { %s130_s16 = smov 128   ;;  %s131_s17 = smov 8  }
  0x11   :  { %19 = dma.hbm_to_vmem [thread:$0]  %s171_s0, 256, %s14_s7, [#allocation4], %s130_s16, %s130_s16, %s131_s17  }
  0x12   :  { %125 = dma.done.wait [#allocation4], 256  }
  0x13   :  { %126 = vsyncadd [#allocation4], 4294967040  ;;  %vm27_vm0 = vcmask 254976   ;;  %v132_v0 = vmov 0.0   ;;  %vm32_vm1 = vcmask 261120   ;;  %v29_v1 = vld [vmem:[#allocation3] sm:$0xff] }
  0x14   :  { %28 = vst.msk [vmem:[#allocation2] sm:$0x3] %vm27_vm0, %v132_v0  ;;  %v30_v2 = vld [vmem:[#allocation3 + $0x8] sm:$0xff]  ;;  %v33_v3 = vsel %vm32_vm1, %v29_v1, 0.0  ;;  %vm49_vm2 = vcmask 1041409   ;;  %s133_s0 = smov [#allocation6]  }
  0x15   :  { %v40_v4 = vsel %vm32_vm1, %v30_v2, 0.0  ;;  %v34_v5 = vrot.slane %v33_v3, 4  ;;  %s67_s20 = sshll.u32 %s133_s0, 4  ;;  %s68_s20 = int_to_ptr.vmem [resolvable:$true] %s67_s20 }
  0x16   :  { %v41_v6 = vrot.slane %v40_v4, 4  ;;  %s103_s21 = scalar_lea.vmem %s68_s20, 32  ;;  %p108_p9 = scmp.lt.s32.totalorder %s68_s20, %s68_s20 }
  0x17   :  { %v35_v7 = vadd.f32 %v34_v5, %v33_v3  ;;  %p104_p8 = scmp.ne.s32.totalorder %s68_s20, %s103_s21  ;;  %p109_p10 = scmp.lt.s32.totalorder %s103_s21, %s103_s21 }
  0x18   :  { %v42_v8 = vadd.f32 %v41_v6, %v40_v4 }
  0x19   :  { %v36_v9 = vrot.slane %v35_v7, 2  ;;  %p110_p11 = por %p109_p10, %p108_p9 }
  0x1a   :  { %v43_v10 = vrot.slane %v42_v8, 2 }
  0x1b   :  { %v37_v11 = vadd.f32 %v36_v9, %v35_v7  ;;  %v31_v15 = vld [vmem:[#allocation2] sm:$0x3]  ;;  %p111_p12 = pnand %p110_p11, %p104_p8 }
  0x1c   :  { %v44_v12 = vadd.f32 %v43_v10, %v42_v8 }
  0x1d   :  { %v38_v13 = vrot.slane %v37_v11, 1 }
  0x1e   :  { %v45_v14 = vrot.slane %v44_v12, 1 }
  0x1f   :  { %v39_v16 = vadd.f32 %v38_v13, %v37_v11 }
  0x20   :  { %v46_v17 = vadd.f32 %v45_v14, %v44_v12 }
  0x22   :  { %v50_v18 = vsel %vm49_vm2, %v46_v17, %v39_v16 }
  0x23   :  { %v52_v19 = vadd.f32 %v50_v18, %v31_v15 }
  0x25   :  { %54 = vst.msk [vmem:[#allocation2] sm:$0x3] %vm27_vm0, %v52_v19 }
  0x2c   :  { %v58_v20 = vld [vmem:[#allocation2] sm:$0x3] }
  0x2d   :  { %v59_v21 = vmul.f32 0.125, %v58_v20 }
  0x2f   :  { %60 = vst.msk [vmem:[#allocation6] sm:$0x3] %vm27_vm0, %v59_v21 }
  0x30   :  { %114 = shalt.err (!%p111_p12)
}
  0x31   :  { %s115_s24 = scalar_lea.hbm %s172_s1, 32 }
  0x32   :  { %p116_p13 = scmp.ne.s32.totalorder %s172_s1, %s115_s24  ;;  %p119_p0 = scmp.lt.u32.totalorder %s115_s24, %s172_s1 }
  0x34   :  { %p121_p1 = pnand %p119_p0, %p116_p13 }
  0x36   :  { %124 = shalt.err (!%p121_p1)
}
  0x37   :  { %70 = dma.vmem_to_hbm [thread:$0]  %s68_s20, 32, %s172_s1, [#allocation5]  }
  0x38   :  { %127 = dma.done.wait [#allocation5], 32  }
  0x39   :  { %128 = vsyncadd [#allocation5], 4294967264 }
  0x3a   :  { %74 = vsyncpa [#allocation4], 1 }
  0x3b   :  { %75 = vsyncpa [#allocation5], 1 }

</bundles_post_ra>
